<compile_context>
chip_gen: v7x
topology: tpu7x:2x2x1
jax: 0.10.0
libtpu: 0.0.40
codegen_flags: <defaults>
</compile_context>

<pallas_src>
import math
from functools import partial

import jax
import jax.numpy as jnp
from jax.experimental import pallas as pl
from jax.experimental.pallas import tpu as pltpu


def _round_up(n: int, m: int) -> int:
    return ((n + m - 1) // m) * m


def _rect_kernel(x_ref, w_ref, b_ref, r_ref, p_ref, t_ref, *, num_recs):
    # x_ref: (Bt, H)   w_ref: (H, O)   b_ref: (1, O)
    # r_ref: (Bt, 4*nr)   p_ref: (Bt, nr)   t_ref: (Bt, nr)
    y = jnp.dot(x_ref[...], w_ref[...], preferred_element_type=jnp.float32)
    y = y + b_ref[...]                       # (1, O) broadcast over rows, f32
    s = jax.nn.sigmoid(y)
    n4 = 4 * num_recs
    n5 = 5 * num_recs
    r_ref[...] = s[:, :n4].astype(r_ref.dtype)
    p_ref[...] = s[:, n4:n5].astype(p_ref.dtype)
    t_ref[...] = (s[:, n5:] * 360.0).astype(t_ref.dtype)


def prepare_rectangle_params(weight, bias, *, num_recs,
                             compute_dtype=jnp.float32):
    """One-time (parameter-load time) prep: transpose, permute columns to
    [all r cols | all p cols | all theta cols], optional bf16 cast of W.

    weight: (num_recs*6, hidden_dim) torch nn.Linear layout
    bias:   (num_recs*6,)
    returns (w (H, O) in compute_dtype, b (1, O) float32)
    """
    O, H = weight.shape
    assert O == num_recs * 6 and bias.shape == (O,)
    perm = ([6 * i + j for i in range(num_recs) for j in range(4)]
            + [6 * i + 4 for i in range(num_recs)]
            + [6 * i + 5 for i in range(num_recs)])
    perm = jnp.asarray(perm, dtype=jnp.int32)
    w = weight.T[:, perm].astype(compute_dtype)          # (H, O); x @ w == x @ W.T
    b = bias[perm].astype(jnp.float32).reshape(1, O)     # bias kept f32
    return w, b


def _pick_batch_tiling(B: int):
    """Return (B_tile, B_pad). Prefer >=2 grid steps (v7x dual TC) with <=12.5%
    padded-row waste; otherwise a single full-extent tile (zero padding)."""
    if B > 256:
        for t in (512, 256, 128):
            b_pad = _round_up(B, t)
            if b_pad // t >= 2 and (b_pad - B) * 8 <= B:
                return t, b_pad
    if B <= 1024:
        return B, B                    # single tile, no padding needed
    return 128, _round_up(B, 128)      # fallback: <=127 dead rows


def rectangle_module_forward(x, w, b, *, num_recs):
    """Pallas forward. x: (..., H); w, b from prepare_rectangle_params."""
    H, O = w.shape
    x = x.reshape(-1, x.shape[-1])
    B = x.shape[0]
    assert x.shape[1] == H

    x = x.astype(w.dtype)              # no-op if caller already streams bf16/f32

    B_tile, B_pad = _pick_batch_tiling(B)
    if B_pad != B:
        x = jnp.pad(x, ((0, B_pad - B), (0, 0)))

    n4, n1 = 4 * num_recs, num_recs
    itx = jnp.dtype(w.dtype).itemsize

    # VMEM footprint: x / outputs double-buffered tiles + resident W / bias.
    vmem_need = (2 * B_tile * H * itx
                 + 2 * B_tile * O * 4
                 + 2 * H * O * itx
                 + 2 * O * 4)
    vmem_limit = int(min(max(32 << 20, 1.5 * vmem_need + (2 << 20)), 128 << 20))

    cost = pl.CostEstimate(
        flops=2 * B_pad * H * O,
        transcendentals=B_pad * O,
        bytes_accessed=B_pad * H * itx + H * O * itx + O * 4 + B_pad * O * 4)

    # TODO(synk): for large hidden_dim, single-buffer W/bias (pipeline_mode=
    # pl.Buffered(1)) and add a K grid axis with an f32 accumulator so the
    # resident (H, O) weight never has to fit VMEM whole (v7x: 64 MiB/TC).
    r_o, p_o, t_o = pl.pallas_call(
        partial(_rect_kernel, num_recs=num_recs),
        out_shape=(
            jax.ShapeDtypeStruct((B_pad, n4), jnp.float32),
            jax.ShapeDtypeStruct((B_pad, n1), jnp.float32),
            jax.ShapeDtypeStruct((B_pad, n1), jnp.float32),
        ),
        grid=(B_pad // B_tile,),
        in_specs=[
            pl.BlockSpec((B_tile, H), lambda i: (i, 0)),   # x: tiled over batch
            pl.BlockSpec((H, O), lambda i: (0, 0)),        # W: resident
            pl.BlockSpec((1, O), lambda i: (0, 0)),        # bias: resident
        ],
        out_specs=(
            pl.BlockSpec((B_tile, n4), lambda i: (i, 0)),
            pl.BlockSpec((B_tile, n1), lambda i: (i, 0)),
            pl.BlockSpec((B_tile, n1), lambda i: (i, 0)),
        ),
        compiler_params=pltpu.CompilerParams(
            dimension_semantics=("parallel",),
            vmem_limit_bytes=vmem_limit),
        cost_estimate=cost,
    )(x, w, b)

    if B_pad != B:
        r_o, p_o, t_o = r_o[:B], p_o[:B], t_o[:B]
    r = r_o.reshape(B, num_recs, 2, 2)       # contiguous -> free reshape
    return r, p_o, t_o


def _reference(x, weight, bias, num_recs):
    # Direct JAX transcription of the PyTorch module.
    rp = (x @ weight.T + bias).reshape(-1, num_recs, 6)
    r = jax.nn.sigmoid(rp[..., :4]).reshape(-1, num_recs, 2, 2)
    p = jax.nn.sigmoid(rp[..., 4]).reshape(-1, num_recs)
    theta = (jax.nn.sigmoid(rp[..., 5]) * 360.0).reshape(-1, num_recs)
    return r, p, theta


if __name__ == "__main__":
    batch = 2
    hidden_dim = 32
    num_recs = 4
    out_features = num_recs * 6

    key = jax.random.PRNGKey(0)
    kx, kw, kb = jax.random.split(key, 3)

    x = jax.random.normal(kx, (batch, hidden_dim), dtype=jnp.float32)

    # Deterministic parameter init (mimics nn.Linear uniform(-1/sqrt(fan_in),+)),
    # stored in torch layout (out_features, hidden_dim).
    bound = 1.0 / math.sqrt(hidden_dim)
    weight = jax.random.uniform(
        kw, (out_features, hidden_dim), minval=-bound, maxval=bound,
        dtype=jnp.float32)
    bias = jax.random.uniform(
        kb, (out_features,), minval=-bound, maxval=bound, dtype=jnp.float32)

    r_ref, p_ref, theta_ref = _reference(x, weight, bias, num_recs)

    # --- f32 path (bit-faithful to the reference within f32 tolerances) ---
    w32, b32 = prepare_rectangle_params(weight, bias, num_recs=num_recs)
    fwd = jax.jit(partial(rectangle_module_forward, num_recs=num_recs))
    r, p, theta = fwd(x, w32, b32)
    jax.block_until_ready((r, p, theta))

    assert r.shape == (batch, num_recs, 2, 2)
    assert p.shape == (batch, num_recs)
    assert theta.shape == (batch, num_recs)
    assert jnp.allclose(r, r_ref, atol=1e-5, rtol=1e-5)
    assert jnp.allclose(p, p_ref, atol=1e-5, rtol=1e-5)
    assert jnp.allclose(theta, theta_ref, atol=1e-4, rtol=1e-5)

    # --- bf16-streaming path (bandwidth-bound v5e/v6e), f32 MXU accumulation ---
    wbf, bbf = prepare_rectangle_params(weight, bias, num_recs=num_recs,
                                        compute_dtype=jnp.bfloat16)
    r2, p2, t2 = fwd(x.astype(jnp.bfloat16), wbf, bbf)
    jax.block_until_ready((r2, p2, t2))
    assert jnp.allclose(r2, r_ref, atol=2e-2)
    assert jnp.allclose(p2, p_ref, atol=2e-2)
    assert jnp.allclose(t2, theta_ref, atol=8.0)

    print("KERNEL_OK")
</pallas_src>

<mosaic_0001>
module attributes {stable_mosaic.version = 11 : i64} {
  func.func @_rect_kernel(%arg0: i32, %arg1: memref<2x32xf32, #tpu.memory_space<vmem>>, %arg2: memref<32x24xf32, #tpu.memory_space<vmem>>, %arg3: memref<1x24xf32, #tpu.memory_space<vmem>>, %arg4: memref<2x16xf32, #tpu.memory_space<vmem>>, %arg5: memref<2x4xf32, #tpu.memory_space<vmem>>, %arg6: memref<2x4xf32, #tpu.memory_space<vmem>>) attributes {dimension_semantics = [#tpu.dimension_semantics<parallel>], iteration_bounds = array<i64: 1>, scalar_prefetch = 0 : i64, scratch_operands = 0 : i64, tpu.core_type = #tpu.core_type<tc>, window_params = [{transform_indices = @transform_0, window_bounds = array<i64: 2, 32>}, {pipeline_mode = #tpu.pipeline_mode<synchronous>, transform_indices = @transform_1, window_bounds = array<i64: 32, 24>}, {pipeline_mode = #tpu.pipeline_mode<synchronous>, transform_indices = @transform_2, window_bounds = array<i64: 1, 24>}, {transform_indices = @transform_3, window_bounds = array<i64: 2, 16>}, {transform_indices = @transform_4, window_bounds = array<i64: 2, 4>}, {transform_indices = @transform_5, window_bounds = array<i64: 2, 4>}]} {
    %c0 = arith.constant 0 : index
    %c0_0 = arith.constant 0 : index
    %0 = vector.load %arg1[%c0, %c0_0] : memref<2x32xf32, #tpu.memory_space<vmem>>, vector<2x32xf32>
    %c0_1 = arith.constant 0 : index
    %c0_2 = arith.constant 0 : index
    %1 = vector.load %arg2[%c0_1, %c0_2] : memref<32x24xf32, #tpu.memory_space<vmem>>, vector<32x24xf32>
    %cst = arith.constant dense<0.000000e+00> : vector<2x24xf32>
    %2 = tpu.matmul %0, %1, %cst {dimension_numbers = #tpu.dot_dimension_numbers<[1], [0], [0], [1], [0, 0, 1, 1], [], []>} : vector<2x32xf32>, vector<32x24xf32>, vector<2x24xf32> -> vector<2x24xf32>
    %c0_3 = arith.constant 0 : index
    %c0_4 = arith.constant 0 : index
    %3 = vector.load %arg3[%c0_3, %c0_4] : memref<1x24xf32, #tpu.memory_space<vmem>>, vector<1x24xf32>
    %4 = vector.broadcast %3 : vector<1x24xf32> to vector<2x24xf32>
    %5 = arith.addf %2, %4 : vector<2x24xf32>
    %6 = arith.negf %5 : vector<2x24xf32>
    %7 = math.exp %6 : vector<2x24xf32>
    %cst_5 = arith.constant 1.000000e+00 : f32
    %8 = vector.broadcast %cst_5 : f32 to vector<2x24xf32>
    %9 = arith.addf %8, %7 : vector<2x24xf32>
    %10 = arith.divf %8, %9 : vector<2x24xf32>
    %11 = vector.extract_strided_slice %10 {offsets = [0, 0], sizes = [2, 16], strides = [1, 1]} : vector<2x24xf32> to vector<2x16xf32>
    %c0_6 = arith.constant 0 : index
    %c0_7 = arith.constant 0 : index
    %12 = vector.load %arg4[%c0_6, %c0_7] : memref<2x16xf32, #tpu.memory_space<vmem>>, vector<2x16xf32>
    tpu.vector_store %arg4[%c0_6, %c0_7], %11 {strides = array<i32>} : memref<2x16xf32, #tpu.memory_space<vmem>>, vector<2x16xf32>,
    %13 = vector.extract_strided_slice %10 {offsets = [0, 16], sizes = [2, 4], strides = [1, 1]} : vector<2x24xf32> to vector<2x4xf32>
    %c0_8 = arith.constant 0 : index
    %c0_9 = arith.constant 0 : index
    %14 = vector.load %arg5[%c0_8, %c0_9] : memref<2x4xf32, #tpu.memory_space<vmem>>, vector<2x4xf32>
    tpu.vector_store %arg5[%c0_8, %c0_9], %13 {strides = array<i32>} : memref<2x4xf32, #tpu.memory_space<vmem>>, vector<2x4xf32>,
    %15 = vector.extract_strided_slice %10 {offsets = [0, 20], sizes = [2, 4], strides = [1, 1]} : vector<2x24xf32> to vector<2x4xf32>
    %cst_10 = arith.constant 3.600000e+02 : f32
    %16 = vector.broadcast %cst_10 : f32 to vector<2x4xf32>
    %17 = arith.mulf %15, %16 : vector<2x4xf32>
    %c0_11 = arith.constant 0 : index
    %c0_12 = arith.constant 0 : index
    %18 = vector.load %arg6[%c0_11, %c0_12] : memref<2x4xf32, #tpu.memory_space<vmem>>, vector<2x4xf32>
    tpu.vector_store %arg6[%c0_11, %c0_12], %17 {strides = array<i32>} : memref<2x4xf32, #tpu.memory_space<vmem>>, vector<2x4xf32>,
    return
  }
  func.func @transform_0(%arg0: i32) -> (i32, i32) {
    %c0_i32 = arith.constant 0 : i32
    %c0_i32_0 = arith.constant 0 : i32
    return %arg0, %c0_i32 : i32, i32
  }
  func.func @transform_1(%arg0: i32) -> (i32, i32) {
    %c0_i32 = arith.constant 0 : i32
    %c0_i32_0 = arith.constant 0 : i32
    %c0_i32_1 = arith.constant 0 : i32
    return %c0_i32, %c0_i32_0 : i32, i32
  }
  func.func @transform_2(%arg0: i32) -> (i32, i32) {
    %c0_i32 = arith.constant 0 : i32
    %c0_i32_0 = arith.constant 0 : i32
    %c0_i32_1 = arith.constant 0 : i32
    return %c0_i32, %c0_i32_0 : i32, i32
  }
  func.func @transform_3(%arg0: i32) -> (i32, i32) {
    %c0_i32 = arith.constant 0 : i32
    %c0_i32_0 = arith.constant 0 : i32
    return %arg0, %c0_i32 : i32, i32
  }
  func.func @transform_4(%arg0: i32) -> (i32, i32) {
    %c0_i32 = arith.constant 0 : i32
    %c0_i32_0 = arith.constant 0 : i32
    return %arg0, %c0_i32 : i32, i32
  }
  func.func @transform_5(%arg0: i32) -> (i32, i32) {
    %c0_i32 = arith.constant 0 : i32
    %c0_i32_0 = arith.constant 0 : i32
    return %arg0, %c0_i32 : i32, i32
  }
}

</mosaic_0001>

<bundles_post_ra>
// kernel: rectangle_module_forward.1
= control target key start
LH: loop header
LB: loop body
LE: loop exit
PB: predicated region body
PF: predicated region fallthrough
CT: control target
= control target key end

     0   :  { %11 = vsyncpa [#allocation3], 0  ;;  %v241_v3 = vmov 0.0|0.0   ;;  %vm242_vm0 = vmmov 0   ;;  %v243_v6 = vmov 0.0   ;;  %s325_s0 = inlined_call_operand.vmem [shape: f32[2,32], index: 0, kind: input, shape index: {}]   ;;  %s326_s1 = inlined_call_operand.vmem [shape: f32[32,24], index: 1, kind: input, shape index: {}]   ;;  %s327_s2 = inlined_call_operand.vmem [shape: f32[1,24], index: 2, kind: input, shape index: {}]   ;;  %s328_s3 = inlined_call_operand.vmem [shape: f32[2,16], index: 3, kind: output, shape index: {0}]   ;;  %s329_s4 = inlined_call_operand.hbm [shape: f32[2,4], index: 4, kind: output, shape index: {1}]   ;;  %s330_s5 = inlined_call_operand.hbm [shape: f32[2,4], index: 5, kind: output, shape index: {2}]  }
   0x1   :  { %v20_v0 = vld [vmem:[%s326_s1] sm:$0xff]  ;;  %v21_v1 = vld [vmem:[%s326_s1 + $0x8] sm:$0xff]  ;;  %v22_v2 = vld [vmem:[%s326_s1 + $0x10] sm:$0xff]  ;;  %176 = vmatprep.subr.bf16.mxu0 %v241_v3  ;;  %173 = vmatprep.mubr.msk.f32.mxu0 %vm242_vm0, %v243_v6 }
   0x2   :  { %v177_v4 = vpack.c.bf16 %v21_v1, %v20_v0  ;;  %v23_v5 = vld [vmem:[%s326_s1 + $0x18] sm:$0xff] }
   0x3   :  { %12 = vsyncpa [#allocation5], 0  ;;  %v180_v7 = vpack.c.bf16 %v23_v5, %v22_v2  ;;  %v19_v8 = vld [vmem:[%s325_s0] sm:$0x3]  ;;  %vm31_vm1 = vcmask 261120   ;;  %vm111_vm2 = vcmask 123904  }
   0x4   :  { %178 = vmatpush3.bf16.msra.mxu0 %v177_v4  ;;  %v157_v9 = vld [vmem:[%s327_s2] ss:$0 sm:$0xff]  ;;  %s244_s0 = smov 112   ;;  %s245_s6 = smov 108   ;;  %vm117_vm3 = vcmask 25600  }
   0x5   :  { %179 = vmatprep.subr.bf16.mxu0 %v241_v3  ;;  %s246_s2 = smov [#allocation2]   ;;  %s247_s8 = smov [#allocation4]  }
   0x6   :  { %s133_s7 = sshll.u32 %s246_s2, 4  ;;  %s143_s9 = sshll.u32 %s247_s8, 4  ;;  %s134_s7 = int_to_ptr.vmem [resolvable:$true] %s133_s7  ;;  %s144_s9 = int_to_ptr.vmem [resolvable:$true] %s143_s9 }
   0x7   :  { %s193_s10 = scalar_lea.vmem %s134_s7, 32  ;;  %p198_p1 = scmp.lt.s32.totalorder %s134_s7, %s134_s7 }
   0x8   :  { %181 = vmatpush3.bf16.msra.mxu0 %v180_v7  ;;  %p194_p0 = scmp.ne.s32.totalorder %s134_s7, %s193_s10  ;;  %p199_p2 = scmp.lt.s32.totalorder %s193_s10, %s193_s10 }
   0xa   :  { %p200_p3 = por %p199_p2, %p198_p1 }
   0xb   :  { %174 = vmatmul.mubr.msk.f32.vlgmr.msra.gmra.mrb[0].mxu0 %vm31_vm1, %v19_v8 }
   0xc   :  { %p201_p4 = pnand %p200_p3, %p194_p0 }
  0xde   :  { %v101_v10 = vpop.f32.mrb[0].mxu0 }
  0xdf   :  { %v102_v11 = vadd.f32 %v157_v9, %v101_v10  ;;  %v175_v12 = vpop.f32.mrb[1].mxu0 }
  0xe1   :  { %v159_v13 = vmul.f32 -1.442695, %v102_v11 }
  0xe3   :  { %189 = vpow2.f32 %v159_v13 }
  0xed   :  { %v190_v14 = vpop.eup %189 }
  0xee   :  { %v108_v15 = vadd.f32 1.0, %v190_v14 }
  0xf0   :  { %191 = vrcp.f32 %v108_v15 }
  0xfa   :  { %v192_v16 = vpop.eup %191 }
  0xfb   :  { %112 = vst.msk [vmem:[%s328_s3] sm:$0x3] %vm111_vm2, %v192_v16  ;;  %114 = vrot.lane.b32.xlu0 %v192_v16, %s244_s0  ;;  %v119_v17 = vmul.f32 360.0, %v192_v16 }
  0xff   :  { %121 = vrot.lane.b32.xlu0 %v119_v17, %s245_s6 }
 0x16d   :  { %v115_v18 = vpop.permute.xlu0 %114 }
 0x16e   :  { %118 = vst.msk [vmem:[#allocation2] sm:$0x3] %vm117_vm3, %v115_v18 }
 0x16f   :  { %204 = shalt.err (!%p201_p4)
}
 0x170   :  { %s205_s12 = scalar_lea.hbm %s329_s4, 32 }
 0x171   :  { %p206_p5 = scmp.ne.s32.totalorder %s329_s4, %s205_s12  ;;  %p209_p6 = scmp.lt.u32.totalorder %s205_s12, %s329_s4 }
 0x173   :  { %p211_p7 = pnand %p209_p6, %p206_p5 }
 0x175   :  { %214 = shalt.err (!%p211_p7)
}
 0x176   :  { %136 = dma.vmem_to_hbm [thread:$0]  %s134_s7, 32, %s329_s4, [#allocation3]   ;;  %v122_v19 = vpop.permute.xlu0 %121 }
 0x177   :  { %124 = vst.msk [vmem:[#allocation4] sm:$0x3] %vm117_vm3, %v122_v19  ;;  %s215_s19 = scalar_lea.vmem %s144_s9, 32  ;;  %p220_p9 = scmp.lt.s32.totalorder %s144_s9, %s144_s9 }
 0x178   :  { %p216_p8 = scmp.ne.s32.totalorder %s144_s9, %s215_s19  ;;  %p221_p10 = scmp.lt.s32.totalorder %s215_s19, %s215_s19 }
 0x17a   :  { %p222_p11 = por %p221_p10, %p220_p9 }
 0x17c   :  { %p223_p12 = pnand %p222_p11, %p216_p8 }
 0x17e   :  { %226 = shalt.err (!%p223_p12)
}
 0x17f   :  { %s227_s22 = scalar_lea.hbm %s330_s5, 32 }
 0x180   :  { %p228_p13 = scmp.ne.s32.totalorder %s330_s5, %s227_s22  ;;  %p231_p0 = scmp.lt.u32.totalorder %s227_s22, %s330_s5 }
 0x182   :  { %p233_p1 = pnand %p231_p0, %p228_p13 }
 0x184   :  { %236 = shalt.err (!%p233_p1)
}
 0x185   :  { %146 = dma.vmem_to_hbm [thread:$0]  %s144_s9, 32, %s330_s5, [#allocation5]  }
 0x186   :  { %237 = dma.done.wait [#allocation3], 32  }
 0x187   :  { %238 = vsyncadd [#allocation3], 4294967264 }
 0x188   :  { %239 = dma.done.wait [#allocation5], 32  }
 0x189   :  { %240 = vsyncadd [#allocation5], 4294967264 }
 0x18a   :  { %155 = vsyncpa [#allocation3], 1 }
 0x18b   :  { %156 = vsyncpa [#allocation5], 1 }

</bundles_post_ra>
